<compile_context>
chip_gen: v7x
topology: tpu7x:2x2x1
jax: 0.10.0
libtpu: 0.0.40
codegen_flags: <defaults>
</compile_context>

<pallas_src>
import functools
import math

import jax
import jax.numpy as jnp
from jax.experimental import pallas as pl
from jax.experimental.pallas import tpu as pltpu


def mha_kernel(q_ref, k_ref, v_ref, mask_ref, wq_ref, wc_ref, gamma_ref, beta_ref,
               out_ref, cov_ref, *, num_heads, d_head):
    """One batch element per grid step."""
    q = q_ref[0]          # (Lq, D)
    k = k_ref[0]          # (Lk, D)
    v = v_ref[0]          # (Lk, D)
    mask = mask_ref[0]    # (Lq, Lk) float32, 1.0 == masked

    lq, d_model = q.shape
    lk = k.shape[0]
    inv_scale = jnp.float32(1.0 / math.sqrt(d_head))

    # fc_query projection (bias-free). NOTE: the original module also computes
    # fc_key(key) / fc_value(value) but immediately overwrites those with the
    # raw key/value via _prepare_proj(key/value), so that dead compute is
    # intentionally skipped here.
    pq = jnp.dot(q, wq_ref[...], preferred_element_type=jnp.float32)   # (Lq, D)

    cov_acc = jnp.zeros((lq, lk), jnp.float32)
    ctx_parts = []
    for hd in range(num_heads):                       # static unroll over heads
        sl = slice(hd * d_head, (hd + 1) * d_head)
        q_h = pq[:, sl]                               # (Lq, dh)
        k_h = k[:, sl]                                # (Lk, dh)
        v_h = v[:, sl]                                # (Lk, dh)

        # scores = q_h @ k_h^T (contract last dims, no explicit transpose)
        s = jax.lax.dot_general(q_h, k_h, (((1,), (1,)), ((), ())),
                                preferred_element_type=jnp.float32)    # (Lq, Lk)
        s = s * inv_scale
        s = jnp.where(mask > 0, -jnp.inf, s)          # masked_fill(-inf)

        m = jnp.max(s, axis=-1, keepdims=True)        # stable softmax over Lk
        e = jnp.exp(s - m)
        attn = e / jnp.sum(e, axis=-1, keepdims=True)                  # (Lq, Lk)

        cov_acc = cov_acc + attn
        # TODO(synk): attn_dropout omitted (eval-mode identity).
        ctx_parts.append(jnp.dot(attn, v_h, preferred_element_type=jnp.float32))

    cov_ref[0] = cov_acc * jnp.float32(1.0 / num_heads)                # coverage

    # concat heads along lanes and apply fc_concat in one MXU push
    ctx = jnp.concatenate(ctx_parts, axis=-1)                          # (Lq, D)
    out = jnp.dot(ctx, wc_ref[...], preferred_element_type=jnp.float32)

    # residual + LayerNorm (unbiased std, eps added to std — as in the module).
    # TODO(synk): dropout on `out` omitted (eval-mode identity).
    x = q + out
    mean = jnp.mean(x, axis=-1, keepdims=True)
    xc = x - mean
    var = jnp.sum(xc * xc, axis=-1, keepdims=True) * jnp.float32(1.0 / (d_model - 1))
    std = jnp.sqrt(var)
    out_ref[0] = gamma_ref[...] * xc / (std + jnp.float32(1e-6)) + beta_ref[...]


def init_params(key, d_model):
    keys = jax.random.split(key, 6)
    scale = 1.0 / math.sqrt(d_model)
    rnd = lambda k, shp, s=scale: s * jax.random.normal(k, shp, jnp.float32)
    return {
        # Linear weights stored (in_features, out_features): x @ W.
        'w_q': rnd(keys[0], (d_model, d_model)),
        # fc_key / fc_value exist in the module but are dead in its forward
        # (outputs overwritten by _prepare_proj(key/value)); kept for parity.
        'w_k': rnd(keys[1], (d_model, d_model)),
        'w_v': rnd(keys[2], (d_model, d_model)),
        'w_concat': rnd(keys[3], (d_model, d_model)),
        # LayerNorm params (perturbed from 1/0 so the test exercises them).
        'gamma': 1.0 + 0.1 * jax.random.normal(keys[4], (1, d_model), jnp.float32),
        'beta': 0.1 * jax.random.normal(keys[5], (1, d_model), jnp.float32),
    }


@functools.partial(jax.jit, static_argnames=('num_heads',))
def mha_forward(params, query, key, value, mask, *, num_heads):
    """query: (B,Lq,D) f32; key/value: (B,Lk,D) f32; mask: (B,Lq,Lk) bool (True=masked)."""
    b, lq, d_model = query.shape
    lk = key.shape[1]
    assert d_model % num_heads == 0
    d_head = d_model // num_heads
    mask_f = mask.astype(jnp.float32)

    kernel = functools.partial(mha_kernel, num_heads=num_heads, d_head=d_head)

    batch3 = lambda s1, s2: pl.BlockSpec((1, s1, s2), lambda bi: (bi, 0, 0))
    resident2 = lambda s1, s2: pl.BlockSpec((s1, s2), lambda bi: (0, 0))

    out, cov = pl.pallas_call(
        kernel,
        out_shape=(jax.ShapeDtypeStruct((b, lq, d_model), jnp.float32),
                   jax.ShapeDtypeStruct((b, lq, lk), jnp.float32)),
        grid=(b,),
        in_specs=[
            batch3(lq, d_model),          # query
            batch3(lk, d_model),          # key
            batch3(lk, d_model),          # value
            batch3(lq, lk),               # mask
            resident2(d_model, d_model),  # w_q      (VMEM-resident across grid)
            resident2(d_model, d_model),  # w_concat (VMEM-resident across grid)
            resident2(1, d_model),        # gamma
            resident2(1, d_model),        # beta
        ],
        out_specs=(batch3(lq, d_model), batch3(lq, lk)),
        compiler_params=pltpu.CompilerParams(dimension_semantics=("parallel",)),
    )(query, key, value, mask_f, params['w_q'], params['w_concat'],
      params['gamma'], params['beta'])
    return out, cov


def reference_forward(params, query, key, value, mask, num_heads):
    """Pure-JAX reference mirroring the PyTorch forward (incl. its key/value quirk)."""
    b, lq, d = query.shape
    lk = key.shape[1]
    dh = d // num_heads

    pq = query @ params['w_q']                                    # fc_query
    split = lambda x, l: x.reshape(b, l, num_heads, dh).transpose(0, 2, 1, 3)
    qh = split(pq, lq)
    kh = split(key, lk)      # original module uses raw key here
    vh = split(value, lk)    # original module uses raw value here

    scores = jnp.einsum('bhqd,bhkd->bhqk', qh, kh) / math.sqrt(dh)
    scores = jnp.where(mask[:, None, :, :], -jnp.inf, scores)
    attn = jax.nn.softmax(scores, axis=-1)
    coverage = jnp.mean(attn, axis=1)
    ctx = jnp.einsum('bhqk,bhkd->bhqd', attn, vh)
    ctx = ctx.transpose(0, 2, 1, 3).reshape(b, lq, d)
    out = ctx @ params['w_concat']

    x = query + out
    mean = jnp.mean(x, axis=-1, keepdims=True)
    var = jnp.sum((x - mean) ** 2, axis=-1, keepdims=True) / (d - 1)
    std = jnp.sqrt(var)
    out = params['gamma'] * (x - mean) / (std + 1e-6) + params['beta']
    return out, coverage


if __name__ == "__main__":
    NUM_HEADS = 4
    D_MODEL = 128          # lane-dense model dim (d_head = 32)
    BATCH = 2
    LEN_Q = 16
    LEN_K = 16

    root = jax.random.PRNGKey(0)
    k_par, k_q, k_k, k_v, k_m = jax.random.split(root, 5)

    params = init_params(k_par, D_MODEL)
    query = jax.random.normal(k_q, (BATCH, LEN_Q, D_MODEL), jnp.float32)
    key = jax.random.normal(k_k, (BATCH, LEN_K, D_MODEL), jnp.float32)
    value = jax.random.normal(k_v, (BATCH, LEN_K, D_MODEL), jnp.float32)
    # padding-style mask: True == masked; keep key position 0 always visible so
    # no row is fully masked (the PyTorch module would NaN there anyway).
    mask = jax.random.bernoulli(k_m, 0.3, (BATCH, LEN_Q, LEN_K))
    mask = mask.at[:, :, 0].set(False)

    out, cov = mha_forward(params, query, key, value, mask, num_heads=NUM_HEADS)
    jax.block_until_ready((out, cov))

    out_ref, cov_ref = reference_forward(params, query, key, value, mask, NUM_HEADS)
    assert jnp.allclose(out, out_ref, atol=2e-4, rtol=2e-4), \
        f"out mismatch, max abs diff {jnp.max(jnp.abs(out - out_ref))}"
    assert jnp.allclose(cov, cov_ref, atol=1e-4, rtol=1e-4), \
        f"coverage mismatch, max abs diff {jnp.max(jnp.abs(cov - cov_ref))}"
    # sanity: coverage rows are means of softmax rows -> sum to 1
    assert jnp.allclose(jnp.sum(cov, axis=-1), 1.0, atol=1e-4)

    print("KERNEL_OK")
</pallas_src>

<mosaic_0001>
module attributes {stable_mosaic.version = 11 : i64} {
  func.func @mha_kernel(%arg0: i32, %arg1: memref<1x16x128xf32, #tpu.memory_space<vmem>>, %arg2: memref<1x16x128xf32, #tpu.memory_space<vmem>>, %arg3: memref<1x16x128xf32, #tpu.memory_space<vmem>>, %arg4: memref<1x16x16xf32, #tpu.memory_space<vmem>>, %arg5: memref<128x128xf32, #tpu.memory_space<vmem>>, %arg6: memref<128x128xf32, #tpu.memory_space<vmem>>, %arg7: memref<1x128xf32, #tpu.memory_space<vmem>>, %arg8: memref<1x128xf32, #tpu.memory_space<vmem>>, %arg9: memref<1x16x128xf32, #tpu.memory_space<vmem>>, %arg10: memref<1x16x16xf32, #tpu.memory_space<vmem>>) attributes {dimension_semantics = [#tpu.dimension_semantics<parallel>], iteration_bounds = array<i64: 2>, scalar_prefetch = 0 : i64, scratch_operands = 0 : i64, tpu.core_type = #tpu.core_type<tc>, window_params = [{transform_indices = @transform_0, window_bounds = array<i64: 1, 16, 128>}, {transform_indices = @transform_1, window_bounds = array<i64: 1, 16, 128>}, {transform_indices = @transform_2, window_bounds = array<i64: 1, 16, 128>}, {transform_indices = @transform_3, window_bounds = array<i64: 1, 16, 16>}, {pipeline_mode = #tpu.pipeline_mode<synchronous>, transform_indices = @transform_4, window_bounds = array<i64: 128, 128>}, {pipeline_mode = #tpu.pipeline_mode<synchronous>, transform_indices = @transform_5, window_bounds = array<i64: 128, 128>}, {pipeline_mode = #tpu.pipeline_mode<synchronous>, transform_indices = @transform_6, window_bounds = array<i64: 1, 128>}, {pipeline_mode = #tpu.pipeline_mode<synchronous>, transform_indices = @transform_7, window_bounds = array<i64: 1, 128>}, {transform_indices = @transform_8, window_bounds = array<i64: 1, 16, 128>}, {transform_indices = @transform_9, window_bounds = array<i64: 1, 16, 16>}]} {
    %c0 = arith.constant 0 : index
    %c0_0 = arith.constant 0 : index
    %c0_1 = arith.constant 0 : index
    %0 = vector.load %arg1[%c0, %c0_0, %c0_1] : memref<1x16x128xf32, #tpu.memory_space<vmem>>, vector<1x16x128xf32>
    %1 = vector.shape_cast %0 : vector<1x16x128xf32> to vector<16x128xf32>
    %c0_2 = arith.constant 0 : index
    %c0_3 = arith.constant 0 : index
    %c0_4 = arith.constant 0 : index
    %2 = vector.load %arg2[%c0_2, %c0_3, %c0_4] : memref<1x16x128xf32, #tpu.memory_space<vmem>>, vector<1x16x128xf32>
    %3 = vector.shape_cast %2 : vector<1x16x128xf32> to vector<16x128xf32>
    %c0_5 = arith.constant 0 : index
    %c0_6 = arith.constant 0 : index
    %c0_7 = arith.constant 0 : index
    %4 = vector.load %arg3[%c0_5, %c0_6, %c0_7] : memref<1x16x128xf32, #tpu.memory_space<vmem>>, vector<1x16x128xf32>
    %5 = vector.shape_cast %4 : vector<1x16x128xf32> to vector<16x128xf32>
    %c0_8 = arith.constant 0 : index
    %c0_9 = arith.constant 0 : index
    %c0_10 = arith.constant 0 : index
    %6 = vector.load %arg4[%c0_8, %c0_9, %c0_10] : memref<1x16x16xf32, #tpu.memory_space<vmem>>, vector<1x16x16xf32>
    %7 = vector.shape_cast %6 : vector<1x16x16xf32> to vector<16x16xf32>
    %c0_11 = arith.constant 0 : index
    %c0_12 = arith.constant 0 : index
    %8 = vector.load %arg5[%c0_11, %c0_12] : memref<128x128xf32, #tpu.memory_space<vmem>>, vector<128x128xf32>
    %cst = arith.constant dense<0.000000e+00> : vector<16x128xf32>
    %9 = tpu.matmul %1, %8, %cst {dimension_numbers = #tpu.dot_dimension_numbers<[1], [0], [0], [1], [0, 0, 1, 1], [], []>} : vector<16x128xf32>, vector<128x128xf32>, vector<16x128xf32> -> vector<16x128xf32>
    %cst_13 = arith.constant 0.000000e+00 : f32
    %10 = vector.broadcast %cst_13 : f32 to vector<16x16xf32>
    %11 = vector.extract_strided_slice %9 {offsets = [0, 0], sizes = [16, 32], strides = [1, 1]} : vector<16x128xf32> to vector<16x32xf32>
    %12 = vector.extract_strided_slice %3 {offsets = [0, 0], sizes = [16, 32], strides = [1, 1]} : vector<16x128xf32> to vector<16x32xf32>
    %13 = vector.extract_strided_slice %5 {offsets = [0, 0], sizes = [16, 32], strides = [1, 1]} : vector<16x128xf32> to vector<16x32xf32>
    %cst_14 = arith.constant dense<0.000000e+00> : vector<16x16xf32>
    %14 = tpu.matmul %11, %12, %cst_14 {dimension_numbers = #tpu.dot_dimension_numbers<[1], [1], [0], [0], [0, 0, 1, 0], [], []>} : vector<16x32xf32>, vector<16x32xf32>, vector<16x16xf32> -> vector<16x16xf32>
    %cst_15 = arith.constant 0.176776692 : f32
    %15 = vector.broadcast %cst_15 : f32 to vector<16x16xf32>
    %16 = arith.mulf %14, %15 : vector<16x16xf32>
    %cst_16 = arith.constant 0.000000e+00 : f32
    %17 = vector.broadcast %cst_16 : f32 to vector<16x16xf32>
    %18 = arith.cmpf ogt, %7, %17 : vector<16x16xf32>
    %cst_17 = arith.constant 0xFF800000 : f32
    %19 = vector.broadcast %cst_17 : f32 to vector<16x16xf32>
    %20 = arith.select %18, %19, %16 : vector<16x16xi1>, vector<16x16xf32>
    %cst_18 = arith.constant dense<0xFF800000> : vector<16xf32>
    %21 = vector.multi_reduction <maximumf>, %20, %cst_18 [1] : vector<16x16xf32> to vector<16xf32>
    %22 = vector.shape_cast %21 : vector<16xf32> to vector<16x1xf32>
    %23 = vector.broadcast %22 : vector<16x1xf32> to vector<16x16xf32>
    %24 = arith.subf %20, %23 : vector<16x16xf32>
    %25 = math.exp %24 : vector<16x16xf32>
    %cst_19 = arith.constant dense<0.000000e+00> : vector<16xf32>
    %26 = vector.multi_reduction <add>, %25, %cst_19 [1] : vector<16x16xf32> to vector<16xf32>
    %27 = vector.shape_cast %26 : vector<16xf32> to vector<16x1xf32>
    %28 = vector.broadcast %27 : vector<16x1xf32> to vector<16x16xf32>
    %29 = arith.divf %25, %28 : vector<16x16xf32>
    %30 = arith.addf %10, %29 : vector<16x16xf32>
    %cst_20 = arith.constant dense<0.000000e+00> : vector<16x32xf32>
    %31 = tpu.matmul %29, %13, %cst_20 {dimension_numbers = #tpu.dot_dimension_numbers<[1], [0], [0], [1], [0, 0, 1, 1], [], []>} : vector<16x16xf32>, vector<16x32xf32>, vector<16x32xf32> -> vector<16x32xf32>
    %32 = vector.extract_strided_slice %9 {offsets = [0, 32], sizes = [16, 32], strides = [1, 1]} : vector<16x128xf32> to vector<16x32xf32>
    %33 = vector.extract_strided_slice %3 {offsets = [0, 32], sizes = [16, 32], strides = [1, 1]} : vector<16x128xf32> to vector<16x32xf32>
    %34 = vector.extract_strided_slice %5 {offsets = [0, 32], sizes = [16, 32], strides = [1, 1]} : vector<16x128xf32> to vector<16x32xf32>
    %cst_21 = arith.constant dense<0.000000e+00> : vector<16x16xf32>
    %35 = tpu.matmul %32, %33, %cst_21 {dimension_numbers = #tpu.dot_dimension_numbers<[1], [1], [0], [0], [0, 0, 1, 0], [], []>} : vector<16x32xf32>, vector<16x32xf32>, vector<16x16xf32> -> vector<16x16xf32>
    %cst_22 = arith.constant 0.176776692 : f32
    %36 = vector.broadcast %cst_22 : f32 to vector<16x16xf32>
    %37 = arith.mulf %35, %36 : vector<16x16xf32>
    %cst_23 = arith.constant 0.000000e+00 : f32
    %38 = vector.broadcast %cst_23 : f32 to vector<16x16xf32>
    %39 = arith.cmpf ogt, %7, %38 : vector<16x16xf32>
    %cst_24 = arith.constant 0xFF800000 : f32
    %40 = vector.broadcast %cst_24 : f32 to vector<16x16xf32>
    %41 = arith.select %39, %40, %37 : vector<16x16xi1>, vector<16x16xf32>
    %cst_25 = arith.constant dense<0xFF800000> : vector<16xf32>
    %42 = vector.multi_reduction <maximumf>, %41, %cst_25 [1] : vector<16x16xf32> to vector<16xf32>
    %43 = vector.shape_cast %42 : vector<16xf32> to vector<16x1xf32>
    %44 = vector.broadcast %43 : vector<16x1xf32> to vector<16x16xf32>
    %45 = arith.subf %41, %44 : vector<16x16xf32>
    %46 = math.exp %45 : vector<16x16xf32>
    %cst_26 = arith.constant dense<0.000000e+00> : vector<16xf32>
    %47 = vector.multi_reduction <add>, %46, %cst_26 [1] : vector<16x16xf32> to vector<16xf32>
    %48 = vector.shape_cast %47 : vector<16xf32> to vector<16x1xf32>
    %49 = vector.broadcast %48 : vector<16x1xf32> to vector<16x16xf32>
    %50 = arith.divf %46, %49 : vector<16x16xf32>
    %51 = arith.addf %30, %50 : vector<16x16xf32>
    %cst_27 = arith.constant dense<0.000000e+00> : vector<16x32xf32>
    %52 = tpu.matmul %50, %34, %cst_27 {dimension_numbers = #tpu.dot_dimension_numbers<[1], [0], [0], [1], [0, 0, 1, 1], [], []>} : vector<16x16xf32>, vector<16x32xf32>, vector<16x32xf32> -> vector<16x32xf32>
    %53 = vector.extract_strided_slice %9 {offsets = [0, 64], sizes = [16, 32], strides = [1, 1]} : vector<16x128xf32> to vector<16x32xf32>
    %54 = vector.extract_strided_slice %3 {offsets = [0, 64], sizes = [16, 32], strides = [1, 1]} : vector<16x128xf32> to vector<16x32xf32>
    %55 = vector.extract_strided_slice %5 {offsets = [0, 64], sizes = [16, 32], strides = [1, 1]} : vector<16x128xf32> to vector<16x32xf32>
    %cst_28 = arith.constant dense<0.000000e+00> : vector<16x16xf32>
    %56 = tpu.matmul %53, %54, %cst_28 {dimension_numbers = #tpu.dot_dimension_numbers<[1], [1], [0], [0], [0, 0, 1, 0], [], []>} : vector<16x32xf32>, vector<16x32xf32>, vector<16x16xf32> -> vector<16x16xf32>
    %cst_29 = arith.constant 0.176776692 : f32
    %57 = vector.broadcast %cst_29 : f32 to vector<16x16xf32>
    %58 = arith.mulf %56, %57 : vector<16x16xf32>
    %cst_30 = arith.constant 0.000000e+00 : f32
    %59 = vector.broadcast %cst_30 : f32 to vector<16x16xf32>
    %60 = arith.cmpf ogt, %7, %59 : vector<16x16xf32>
    %cst_31 = arith.constant 0xFF800000 : f32
    %61 = vector.broadcast %cst_31 : f32 to vector<16x16xf32>
    %62 = arith.select %60, %61, %58 : vector<16x16xi1>, vector<16x16xf32>
    %cst_32 = arith.constant dense<0xFF800000> : vector<16xf32>
    %63 = vector.multi_reduction <maximumf>, %62, %cst_32 [1] : vector<16x16xf32> to vector<16xf32>
    %64 = vector.shape_cast %63 : vector<16xf32> to vector<16x1xf32>
    %65 = vector.broadcast %64 : vector<16x1xf32> to vector<16x16xf32>
    %66 = arith.subf %62, %65 : vector<16x16xf32>
    %67 = math.exp %66 : vector<16x16xf32>
    %cst_33 = arith.constant dense<0.000000e+00> : vector<16xf32>
    %68 = vector.multi_reduction <add>, %67, %cst_33 [1] : vector<16x16xf32> to vector<16xf32>
    %69 = vector.shape_cast %68 : vector<16xf32> to vector<16x1xf32>
    %70 = vector.broadcast %69 : vector<16x1xf32> to vector<16x16xf32>
    %71 = arith.divf %67, %70 : vector<16x16xf32>
    %72 = arith.addf %51, %71 : vector<16x16xf32>
    %cst_34 = arith.constant dense<0.000000e+00> : vector<16x32xf32>
    %73 = tpu.matmul %71, %55, %cst_34 {dimension_numbers = #tpu.dot_dimension_numbers<[1], [0], [0], [1], [0, 0, 1, 1], [], []>} : vector<16x16xf32>, vector<16x32xf32>, vector<16x32xf32> -> vector<16x32xf32>
    %74 = vector.extract_strided_slice %9 {offsets = [0, 96], sizes = [16, 32], strides = [1, 1]} : vector<16x128xf32> to vector<16x32xf32>
    %75 = vector.extract_strided_slice %3 {offsets = [0, 96], sizes = [16, 32], strides = [1, 1]} : vector<16x128xf32> to vector<16x32xf32>
    %76 = vector.extract_strided_slice %5 {offsets = [0, 96], sizes = [16, 32], strides = [1, 1]} : vector<16x128xf32> to vector<16x32xf32>
    %cst_35 = arith.constant dense<0.000000e+00> : vector<16x16xf32>
    %77 = tpu.matmul %74, %75, %cst_35 {dimension_numbers = #tpu.dot_dimension_numbers<[1], [1], [0], [0], [0, 0, 1, 0], [], []>} : vector<16x32xf32>, vector<16x32xf32>, vector<16x16xf32> -> vector<16x16xf32>
    %cst_36 = arith.constant 0.176776692 : f32
    %78 = vector.broadcast %cst_36 : f32 to vector<16x16xf32>
    %79 = arith.mulf %77, %78 : vector<16x16xf32>
    %cst_37 = arith.constant 0.000000e+00 : f32
    %80 = vector.broadcast %cst_37 : f32 to vector<16x16xf32>
    %81 = arith.cmpf ogt, %7, %80 : vector<16x16xf32>
    %cst_38 = arith.constant 0xFF800000 : f32
    %82 = vector.broadcast %cst_38 : f32 to vector<16x16xf32>
    %83 = arith.select %81, %82, %79 : vector<16x16xi1>, vector<16x16xf32>
    %cst_39 = arith.constant dense<0xFF800000> : vector<16xf32>
    %84 = vector.multi_reduction <maximumf>, %83, %cst_39 [1] : vector<16x16xf32> to vector<16xf32>
    %85 = vector.shape_cast %84 : vector<16xf32> to vector<16x1xf32>
    %86 = vector.broadcast %85 : vector<16x1xf32> to vector<16x16xf32>
    %87 = arith.subf %83, %86 : vector<16x16xf32>
    %88 = math.exp %87 : vector<16x16xf32>
    %cst_40 = arith.constant dense<0.000000e+00> : vector<16xf32>
    %89 = vector.multi_reduction <add>, %88, %cst_40 [1] : vector<16x16xf32> to vector<16xf32>
    %90 = vector.shape_cast %89 : vector<16xf32> to vector<16x1xf32>
    %91 = vector.broadcast %90 : vector<16x1xf32> to vector<16x16xf32>
    %92 = arith.divf %88, %91 : vector<16x16xf32>
    %93 = arith.addf %72, %92 : vector<16x16xf32>
    %cst_41 = arith.constant dense<0.000000e+00> : vector<16x32xf32>
    %94 = tpu.matmul %92, %76, %cst_41 {dimension_numbers = #tpu.dot_dimension_numbers<[1], [0], [0], [1], [0, 0, 1, 1], [], []>} : vector<16x16xf32>, vector<16x32xf32>, vector<16x32xf32> -> vector<16x32xf32>
    %cst_42 = arith.constant 2.500000e-01 : f32
    %95 = vector.broadcast %cst_42 : f32 to vector<16x16xf32>
    %96 = arith.mulf %93, %95 : vector<16x16xf32>
    %c0_43 = arith.constant 0 : index
    %c0_44 = arith.constant 0 : index
    %c0_45 = arith.constant 0 : index
    %97 = vector.load %arg10[%c0_43, %c0_44, %c0_45] : memref<1x16x16xf32, #tpu.memory_space<vmem>>, vector<1x16x16xf32>
    %98 = vector.shape_cast %97 : vector<1x16x16xf32> to vector<16x16xf32>
    %99 = vector.shape_cast %96 : vector<16x16xf32> to vector<1x16x16xf32>
    tpu.vector_store %arg10[%c0_43, %c0_44, %c0_45], %99 {strides = array<i32>} : memref<1x16x16xf32, #tpu.memory_space<vmem>>, vector<1x16x16xf32>,
    %100 = tpu.concatenate %31, %52, %73, %94 in 1 : vector<16x32xf32>, vector<16x32xf32>, vector<16x32xf32>, vector<16x32xf32> -> vector<16x128xf32>
    %c0_46 = arith.constant 0 : index
    %c0_47 = arith.constant 0 : index
    %101 = vector.load %arg6[%c0_46, %c0_47] : memref<128x128xf32, #tpu.memory_space<vmem>>, vector<128x128xf32>
    %cst_48 = arith.constant dense<0.000000e+00> : vector<16x128xf32>
    %102 = tpu.matmul %100, %101, %cst_48 {dimension_numbers = #tpu.dot_dimension_numbers<[1], [0], [0], [1], [0, 0, 1, 1], [], []>} : vector<16x128xf32>, vector<128x128xf32>, vector<16x128xf32> -> vector<16x128xf32>
    %103 = arith.addf %1, %102 : vector<16x128xf32>
    %cst_49 = arith.constant dense<0.000000e+00> : vector<16xf32>
    %104 = vector.multi_reduction <add>, %103, %cst_49 [1] : vector<16x128xf32> to vector<16xf32>
    %105 = vector.shape_cast %104 : vector<16xf32> to vector<16x1xf32>
    %cst_50 = arith.constant 1.280000e+02 : f32
    %106 = vector.broadcast %cst_50 : f32 to vector<16x1xf32>
    %107 = arith.divf %105, %106 : vector<16x1xf32>
    %108 = vector.broadcast %107 : vector<16x1xf32> to vector<16x128xf32>
    %109 = arith.subf %103, %108 : vector<16x128xf32>
    %110 = arith.mulf %109, %109 : vector<16x128xf32>
    %cst_51 = arith.constant dense<0.000000e+00> : vector<16xf32>
    %111 = vector.multi_reduction <add>, %110, %cst_51 [1] : vector<16x128xf32> to vector<16xf32>
    %112 = vector.shape_cast %111 : vector<16xf32> to vector<16x1xf32>
    %cst_52 = arith.constant 0.00787401571 : f32
    %113 = vector.broadcast %cst_52 : f32 to vector<16x1xf32>
    %114 = arith.mulf %112, %113 : vector<16x1xf32>
    %115 = math.sqrt %114 : vector<16x1xf32>
    %c0_53 = arith.constant 0 : index
    %c0_54 = arith.constant 0 : index
    %116 = vector.load %arg7[%c0_53, %c0_54] : memref<1x128xf32, #tpu.memory_space<vmem>>, vector<1x128xf32>
    %117 = vector.broadcast %116 : vector<1x128xf32> to vector<16x128xf32>
    %118 = arith.mulf %117, %109 : vector<16x128xf32>
    %cst_55 = arith.constant 9.99999997E-7 : f32
    %119 = vector.broadcast %cst_55 : f32 to vector<16x1xf32>
    %120 = arith.addf %115, %119 : vector<16x1xf32>
    %121 = vector.broadcast %120 : vector<16x1xf32> to vector<16x128xf32>
    %122 = arith.divf %118, %121 : vector<16x128xf32>
    %c0_56 = arith.constant 0 : index
    %c0_57 = arith.constant 0 : index
    %123 = vector.load %arg8[%c0_56, %c0_57] : memref<1x128xf32, #tpu.memory_space<vmem>>, vector<1x128xf32>
    %124 = vector.broadcast %123 : vector<1x128xf32> to vector<16x128xf32>
    %125 = arith.addf %122, %124 : vector<16x128xf32>
    %c0_58 = arith.constant 0 : index
    %c0_59 = arith.constant 0 : index
    %c0_60 = arith.constant 0 : index
    %126 = vector.load %arg9[%c0_58, %c0_59, %c0_60] : memref<1x16x128xf32, #tpu.memory_space<vmem>>, vector<1x16x128xf32>
    %127 = vector.shape_cast %126 : vector<1x16x128xf32> to vector<16x128xf32>
    %128 = vector.shape_cast %125 : vector<16x128xf32> to vector<1x16x128xf32>
    tpu.vector_store %arg9[%c0_58, %c0_59, %c0_60], %128 {strides = array<i32>} : memref<1x16x128xf32, #tpu.memory_space<vmem>>, vector<1x16x128xf32>,
    return
  }
  func.func @transform_0(%arg0: i32) -> (i32, i32, i32) {
    %c0_i32 = arith.constant 0 : i32
    %c0_i32_0 = arith.constant 0 : i32
    %c0_i32_1 = arith.constant 0 : i32
    return %arg0, %c0_i32, %c0_i32_0 : i32, i32, i32
  }
  func.func @transform_1(%arg0: i32) -> (i32, i32, i32) {
    %c0_i32 = arith.constant 0 : i32
    %c0_i32_0 = arith.constant 0 : i32
    %c0_i32_1 = arith.constant 0 : i32
    return %arg0, %c0_i32, %c0_i32_0 : i32, i32, i32
  }
  func.func @transform_2(%arg0: i32) -> (i32, i32, i32) {
    %c0_i32 = arith.constant 0 : i32
    %c0_i32_0 = arith.constant 0 : i32
    %c0_i32_1 = arith.constant 0 : i32
    return %arg0, %c0_i32, %c0_i32_0 : i32, i32, i32
  }
  func.func @transform_3(%arg0: i32) -> (i32, i32, i32) {
    %c0_i32 = arith.constant 0 : i32
    %c0_i32_0 = arith.constant 0 : i32
    %c0_i32_1 = arith.constant 0 : i32
    return %arg0, %c0_i32, %c0_i32_0 : i32, i32, i32
  }
  func.func @transform_4(%arg0: i32) -> (i32, i32) {
    %c0_i32 = arith.constant 0 : i32
    %c0_i32_0 = arith.constant 0 : i32
    %c0_i32_1 = arith.constant 0 : i32
    return %c0_i32, %c0_i32_0 : i32, i32
  }
  func.func @transform_5(%arg0: i32) -> (i32, i32) {
    %c0_i32 = arith.constant 0 : i32
    %c0_i32_0 = arith.constant 0 : i32
    %c0_i32_1 = arith.constant 0 : i32
    return %c0_i32, %c0_i32_0 : i32, i32
  }
  func.func @transform_6(%arg0: i32) -> (i32, i32) {
    %c0_i32 = arith.constant 0 : i32
    %c0_i32_0 = arith.constant 0 : i32
    %c0_i32_1 = arith.constant 0 : i32
    return %c0_i32, %c0_i32_0 : i32, i32
  }
  func.func @transform_7(%arg0: i32) -> (i32, i32) {
    %c0_i32 = arith.constant 0 : i32
    %c0_i32_0 = arith.constant 0 : i32
    %c0_i32_1 = arith.constant 0 : i32
    return %c0_i32, %c0_i32_0 : i32, i32
  }
  func.func @transform_8(%arg0: i32) -> (i32, i32, i32) {
    %c0_i32 = arith.constant 0 : i32
    %c0_i32_0 = arith.constant 0 : i32
    %c0_i32_1 = arith.constant 0 : i32
    return %arg0, %c0_i32, %c0_i32_0 : i32, i32, i32
  }
  func.func @transform_9(%arg0: i32) -> (i32, i32, i32) {
    %c0_i32 = arith.constant 0 : i32
    %c0_i32_0 = arith.constant 0 : i32
    %c0_i32_1 = arith.constant 0 : i32
    return %arg0, %c0_i32, %c0_i32_0 : i32, i32, i32
  }
}

</mosaic_0001>

<bundles_post_ra>
// kernel: mha_forward.1
= control target key start
LH: loop header
LB: loop body
LE: loop exit
PB: predicated region body
PF: predicated region fallthrough
CT: control target
= control target key end

     0   :  { %s3137_s0 = inlined_call_operand.vmem [shape: f32[2,16,128], index: 0, kind: input, shape index: {}]   ;;  %s3138_s1 = inlined_call_operand.hbm [shape: f32[2,16,128], index: 1, kind: input, shape index: {}]   ;;  %s3139_s2 = inlined_call_operand.hbm [shape: f32[2,16,128], index: 2, kind: input, shape index: {}]   ;;  %s3140_s3 = inlined_call_operand.vmem [shape: f32[2,16,16], index: 3, kind: input, shape index: {}]   ;;  %s3141_s4 = inlined_call_operand.hbm [shape: f32[128,128], index: 4, kind: input, shape index: {}]   ;;  %s3142_s5 = inlined_call_operand.hbm [shape: f32[128,128], index: 5, kind: input, shape index: {}]   ;;  %s3143_s6 = inlined_call_operand.vmem [shape: f32[1,128], index: 6, kind: input, shape index: {}]   ;;  %s3144_s7 = inlined_call_operand.vmem [shape: f32[1,128], index: 7, kind: input, shape index: {}]   ;;  %s3145_s8 = inlined_call_operand.hbm [shape: f32[2,16,128], index: 8, kind: output, shape index: {0}]   ;;  %s3146_s9 = inlined_call_operand.hbm [shape: f32[2,16,16], index: 9, kind: output, shape index: {1}]  }
   0x1   :  { %3156 = sst [smem:[#allocation22_spill]] %s3138_s1 }
   0x2   :  { %3157 = sst [smem:[#allocation23_spill]] %s3141_s4 }
   0x3   :  { %3158 = sst [smem:[#allocation24_spill]] %s3142_s5 }
   0x4   :  { %15 = vsyncpa [#allocation3], 0 }
   0x5   :  { %17 = vsyncpa [#allocation3 + $0x1], 0 }
   0x6   :  { %18 = vsyncpa [#allocation6], 0 }
   0x7   :  { %20 = vsyncpa [#allocation6 + $0x1], 0 }
   0x8   :  { %21 = vsyncpa [#allocation9], 0 }
   0x9   :  { %22 = vsyncpa [#allocation4], 0 }
   0xa   :  { %24 = vsyncpa [#allocation4 + $0x1], 0 }
   0xb   :  { %25 = vsyncpa [#allocation12], 0 }
   0xc   :  { %27 = vsyncpa [#allocation12 + $0x1], 0  ;;  %s2602_s30 = smov 0   ;;  %s2604_s10 = smov 0  }
   0xd   :  { %s2606_s11 = smov 0   ;;  %s2608_s12 = smov 0  }
   0xe LB: > { %3159 = sst [smem:[#allocation19_spill]] %s2533_s11  ;;  %s2623_s13 = sadd.s32 4294967295, %s2537_s12   ;;  %s2537_s12 = sphi %s2608_s12, %s3189_s12   ;;  %s2533_s11 = sphi %s2606_s11, %s3186_s11   ;;  %s2529_s10 = sphi %s2604_s10, %s3188_s10   ;;  %s2525_s30 = sphi %s2602_s30, %s3187_s30  }
   0xf   : > { %s1782_s14 = sadd.s32 4294967294, %s2537_s12   ;;  %p79_p0 = scmp.ne.s32.totalorder %s2529_s10, %s2525_s30 }
  0x10   : > { %p3147_p1 = scmp.eq.s32.totalorder %s2623_s13, 0  ;;  %p245_p3 = scmp.eq.s32.totalorder %s1782_s14, 1 }
  0x11   : > { %p1783_p5 = scmp.ge.s32.totalorder %s2537_s12, 1  ;;  %p278_p7 = scmp.lt.s32.totalorder %s2537_s12, 3 }
  0x12   : > { %p2632_p4 = por %p3147_p1, %p79_p0  ;;  %p2637_p6 = por %p245_p3, %p79_p0 }
  0x13   : > { %p2642_p8 = pnand %p1783_p5, %p278_p7  ;;  %s2539_s18 = smov [#allocation7]  }
  0x14   : > { %s3160_s15 = scalar_select %p2632_p4, 1, 0 }
  0x15   : > { %s3161_s16 = scalar_select %p2637_p6, 1, 0 }
  0x16   : > { %s290_s19 = sshll.u32 %s2539_s18, 4  ;;  %p2158_p9 = pneg %p2642_p8  ;;  %s2646_s19 = int_to_ptr.vmem [resolvable:$true] %s290_s19 }
  0x17   : > { %3162 = sst [smem:[#allocation20_spill]] %s3161_s16  ;;  %s2540_s21 = smov [#allocation8]  }
  0x18   : > { %p2653_p11 = pnand %p2158_p9, %p3147_p1  ;;  %s303_s22 = sshll.u32 %s2540_s21, 4  ;;  %s2657_s22 = int_to_ptr.vmem [resolvable:$true] %s303_s22 }
  0x19   : > { %s3165_s4 = sld [smem:[#allocation23_spill]] }
  0x1a   : > { %p2313_p13 = pneg %p2653_p11 }
  0x1f   : > { %s2311_s25 = scalar_lea.hbm %s3165_s4, 2048 }
  0x20   : > { %p2312_p12 = scmp.ne.s32.totalorder %s3165_s4, %s2311_s25  ;;  %p2318_p5 = scmp.lt.u32.totalorder %s2311_s25, %s3165_s4 }
  0x22   : > { %p2314_p0 = pnand %p2313_p13, %p2312_p12 }
  0x24   : > { %p2315_p3 = pneg %p2314_p0 }
  0x26   : > { %p2320_p7 = pnand %p2318_p5, %p2315_p3 }
  0x28   : > { %2323 = shalt.err (!%p2320_p7)
}
  0x29   : > { %s2324_s14 = scalar_lea.vmem %s2646_s19, 2048  ;;  %p2332_p2 = scmp.lt.s32.totalorder %s2646_s19, %s2646_s19 }
  0x2a   : > { %p2325_p9 = scmp.ne.s32.totalorder %s2646_s19, %s2324_s14  ;;  %p2333_p12 = scmp.lt.s32.totalorder %s2324_s14, %s2324_s14 }
  0x2c   : > { %p2327_p10 = pnand %p2325_p9, %p2313_p13  ;;  %p2334_p0 = por %p2333_p12, %p2332_p2 }
  0x2e   : > { %p2328_p1 = pneg %p2327_p10 }
  0x30   : > { %p2335_p6 = pnand %p2334_p0, %p2328_p1 }
  0x32   : > { %2338 = shalt.err (!%p2335_p6)
}
  0x33   : > { %s3149_s18 = smov 128   ;;  %s3151_s21 = smov 8  }
  0x34   : > { %2161 = dma.hbm_to_vmem [thread:$0]  (!%p2653_p11), %s3165_s4, 2048, %s2646_s19, [#allocation6], %s3149_s18, %s3149_s18, %s3151_s21  }
  0x35   : > { %s3166_s5 = sld [smem:[#allocation24_spill]] }
  0x3b   : > { %s2339_s27 = scalar_lea.hbm %s3166_s5, 2048 }
  0x3c   : > { %p2340_p1 = scmp.ne.s32.totalorder %s3166_s5, %s2339_s27  ;;  %p2346_p10 = scmp.lt.u32.totalorder %s2339_s27, %s3166_s5 }
  0x3e   : > { %p2342_p2 = pnand %p2340_p1, %p2313_p13 }
  0x40   : > { %p2343_p6 = pneg %p2342_p2 }
  0x42   : > { %p2348_p3 = pnand %p2346_p10, %p2343_p6 }
  0x44   : > { %2351 = shalt.err (!%p2348_p3)
}
  0x45   : > { %s2352_s19 = scalar_lea.vmem %s2657_s22, 2048  ;;  %p2360_p12 = scmp.lt.s32.totalorder %s2657_s22, %s2657_s22 }
  0x46   : > { %p2353_p5 = scmp.ne.s32.totalorder %s2657_s22, %s2352_s19  ;;  %p2361_p0 = scmp.lt.s32.totalorder %s2352_s19, %s2352_s19 }
  0x48   : > { %p2355_p7 = pnand %p2353_p5, %p2313_p13  ;;  %p2362_p1 = por %p2361_p0, %p2360_p12 }
  0x4a   : > { %p2356_p9 = pneg %p2355_p7 }
  0x4c   : > { %p2363_p2 = pnand %p2362_p1, %p2356_p9 }
  0x4e   : > { %2366 = shalt.err (!%p2363_p2)
}
  0x4f   : > { %2164 = dma.hbm_to_vmem [thread:$0]  (!%p2653_p11), %s3166_s5, 2048, %s2657_s22, [#allocation9], %s3149_s18, %s3149_s18, %s3151_s21  }
  0x50   : > { %s2718_s20 = sadd.s32 1, %s2537_s12   ;;  %s66_s24 = sadd.s32 1, %s2533_s11 }
  0x51   : > { %s63_s25 = ssub.s32 %s2537_s12, %s2718_s20  ;;  %p73_p13 = scmp.ne.s32.totalorder %s2533_s11, %s2529_s10 }
  0x52   : > { %p64_p6 = scmp.eq.s32.totalorder %s63_s25, 0  ;;  %p74_p10 = scmp.eq.s32.totalorder %s2537_s12, 0 }
  0x53   : > { %p3167_p3 = scmp.eq.s32.totalorder %s2623_s13, 1  ;;  %p2181_p7 = scmp.lt.s32.totalorder %s2537_s12, 2 }
  0x54   : > { %s2734_s27 = scalar_select %p64_p6, %s2533_s11, %s66_s24  }
  0x55   : > { %p2728_p5 = por %p3167_p3, %p73_p13  ;;  %p75_p9 = por %p74_p10, %p73_p13 }
  0x56   : > { %3169 = sst [smem:[#allocation21_spill]] %s2734_s27  ;;  %s331_s28 = sand.u32 1, %s2533_s11  }
  0x57   : > { %s3168_s26 = scalar_select %p2728_p5, 1, 0 }
  0x58   : > { %s1787_s29 = sshll.u32 %s331_s28, 4  ;;  %s1838_s22 = sshll.u32 %s2537_s12, 8 }
  0x59   : > { %s3170_s1 = sld [smem:[#allocation22_spill]]  ;;  %s335_s23 = scalar_lea.vmem [#allocation2], %s1787_s29 }
  0x5a   : > { %s342_s25 = sshll.u32 %s335_s23, 4  ;;  %p2745_p11 = pnand %p2181_p7, %p75_p9  ;;  %s2743_s25 = int_to_ptr.vmem [resolvable:$true] %s342_s25 }
  0x5b   : > { %s2752_s14 = scalar_lea.hbm %s3139_s2, %s1838_s22  ;;  %s356_s19 = scalar_lea.vmem [#allocation5], %s1787_s29 }
  0x5c   : > { %s2754_s4 = sshll.u32 %s356_s19, 4  ;;  %s2756_s5 = scalar_lea.sflag [#allocation3], %s331_s28  ;;  %s2788_s4 = int_to_ptr.vmem [resolvable:$true] %s2754_s4 }
  0x5d   : > { %p2369_p0 = pneg %p2745_p11 }
  0x5f   : > { %s2741_s16 = scalar_lea.hbm %s3170_s1, %s1838_s22  ;;  %s2372_s18 = scalar_lea.hbm %s3170_s1, 512 }
  0x60   : > { %s2367_s23 = scalar_lea.hbm %s2741_s16, 256  ;;  %p2373_p13 = scmp.lt.u32.totalorder %s2741_s16, %s3170_s1 }
  0x61   : > { %p2368_p12 = scmp.ne.s32.totalorder %s2741_s16, %s2367_s23  ;;  %p2374_p6 = scmp.lt.u32.totalorder %s2372_s18, %s2367_s23 }
  0x62   : > { %p2376_p3 = scmp.lt.u32.totalorder %s2367_s23, %s2741_s16 }
  0x63   : > { %p2370_p1 = pnand %p2369_p0, %p2368_p12  ;;  %p2375_p10 = por %p2374_p6, %p2373_p13 }
  0x65   : > { %p2371_p2 = pneg %p2370_p1  ;;  %p2377_p7 = por %p2376_p3, %p2375_p10 }
  0x67   : > { %p2378_p9 = pnand %p2377_p7, %p2371_p2 }
  0x69   : > { %2381 = shalt.err (!%p2378_p9)
}
  0x6a   : > { %s2382_s28 = scalar_lea.vmem %s2743_s25, 256  ;;  %s2543_s11 = smov [#allocation2]  }
  0x6b   : > { %p2383_p12 = scmp.ne.s32.totalorder %s2743_s25, %s2382_s28  ;;  %s2387_s27 = sshll.u32 %s2543_s11, 4  ;;  %s2388_s27 = int_to_ptr.vmem [resolvable:$false] %s2387_s27 }
  0x6c   : > { %s2389_s29 = scalar_lea.vmem %s2388_s27, 512  ;;  %p2390_p4 = scmp.lt.s32.totalorder %s2743_s25, %s2388_s27 }
  0x6d   : > { %p2385_p1 = pnand %p2383_p12, %p2369_p0  ;;  %p2391_p13 = scmp.lt.s32.totalorder %s2389_s29, %s2382_s28 }
  0x6f   : > { %p2386_p5 = pneg %p2385_p1  ;;  %p2392_p6 = por %p2391_p13, %p2390_p4 }
  0x71   : > { %p2393_p10 = pnand %p2392_p6, %p2386_p5 }
  0x73   : > { %2396 = shalt.err (!%p2393_p10)
}
  0x74   : > { %s3172_s19 = smov 8   ;;  %s3173_s23 = smov 128  }
  0x75   : > { %2168 = dma.hbm_to_vmem [thread:$0]  (!%p2745_p11), %s2741_s16, 256, %s2743_s25, %s2756_s5, %s3173_s23, %s3173_s23, %s3172_s19  }
  0x76   : > { %s352_s18 = sand.u32 1, %s2537_s12   ;;  %s2397_s22 = scalar_lea.hbm %s2752_s14, 256 }
  0x77   : > { %s2791_s21 = scalar_lea.sflag [#allocation6], %s352_s18  ;;  %p2398_p4 = scmp.ne.s32.totalorder %s2752_s14, %s2397_s22 }
  0x78   : > { %s2402_s27 = scalar_lea.hbm %s3139_s2, 512  ;;  %p2403_p3 = scmp.lt.u32.totalorder %s2752_s14, %s3139_s2 }
  0x79   : > { %p2400_p5 = pnand %p2398_p4, %p2369_p0  ;;  %p2404_p7 = scmp.lt.u32.totalorder %s2402_s27, %s2397_s22 }
  0x7a   : > { %p2406_p12 = scmp.lt.u32.totalorder %s2397_s22, %s2752_s14 }
  0x7b   : > { %p2401_p2 = pneg %p2400_p5  ;;  %p2405_p9 = por %p2404_p7, %p2403_p3 }
  0x7d   : > { %p2407_p1 = por %p2406_p12, %p2405_p9 }
  0x7f   : > { %p2408_p13 = pnand %p2407_p1, %p2401_p2 }
  0x81   : > { %2411 = shalt.err (!%p2408_p13)
}
  0x82   : > { %s2412_s5 = scalar_lea.vmem %s2788_s4, 256  ;;  %s2544_s16 = smov [#allocation5]  }
  0x83   : > { %p2413_p6 = scmp.ne.s32.totalorder %s2788_s4, %s2412_s5  ;;  %s2417_s25 = sshll.u32 %s2544_s16, 4  ;;  %s2418_s25 = int_to_ptr.vmem [resolvable:$false] %s2417_s25 }
  0x84   : > { %s2419_s1 = scalar_lea.vmem %s2418_s25, 512  ;;  %p2420_p5 = scmp.lt.s32.totalorder %s2788_s4, %s2418_s25 }
  0x85   : > { %p2415_p10 = pnand %p2413_p6, %p2369_p0  ;;  %p2421_p3 = scmp.lt.s32.totalorder %s2419_s1, %s2412_s5 }
  0x87   : > { %p2416_p4 = pneg %p2415_p10  ;;  %p2422_p7 = por %p2421_p3, %p2420_p5 }
  0x89   : > { %p2423_p9 = pnand %p2422_p7, %p2416_p4 }
  0x8b   : > { %2426 = shalt.err (!%p2423_p9)
}
  0x8c   : > { %2171 = dma.hbm_to_vmem [thread:$0]  (!%p2745_p11), %s2752_s14, 256, %s2788_s4, %s2791_s21, %s3173_s23, %s3173_s23, %s3172_s19  }
  0x8d   : > { %383 = sbr.rel (%p2642_p8) target bundleno = 3463 (0xd87), region = 52  ;;  %s2823_s18 = sand.u32 (!%p2642_p8), 1, %s2529_s10  }
  0x8e   : > { %s2826_s22 = sshll.u32 (!%p2642_p8), %s2823_s18, 4  ;;  %s386_s24 = scalar_lea.sflag (!%p2642_p8), [#allocation3], %s2823_s18 }
  0x8f   : > { %s389_s28 = scalar_lea.vmem (!%p2642_p8), [#allocation2], %s2826_s22  ;;  %p3174_p0 = scmp.ne.s32.totalorder (!%p2642_p8), %s3160_s15, 0 }
  0x94   : > { %2500 = dma.done.wait (%p3174_p0), %s386_s24, 256  }
  0x95   : > { %2502 = vsyncadd (%p3174_p0), %s386_s24, 4294967040  ;;  %s394_s4 = sand.u32 1, %s2623_s13   ;;  %s398_s14 = scalar_lea.vmem [#allocation5], %s2826_s22 }
  0x96   : > { %s395_s17 = scalar_lea.sflag [#allocation6], %s394_s4 }
  0x97   : > { %2504 = dma.done.wait (%p3174_p0), %s395_s17, 256  }
  0x98   : > { %2506 = vsyncadd (%p3174_p0), %s395_s17, 4294967040  ;;  %p3175_p8 = scmp.eq.s32.totalorder %s2623_s13, 0 }
  0x9a   : > { %2508 = dma.done.wait (%p3175_p8), [#allocation6], 2048   ;;  %p3176_p11 = pmov %p3175_p8 }
  0x9b   : > { %p3177_p2 = pmov %p3175_p8 }
  0x9c   : > { %2510 = vsyncadd (%p3176_p11), [#allocation6], 4294965248 }
  0x9d   : > { %2512 = dma.done.wait (%p3177_p2), [#allocation9], 2048   ;;  %p3178_p12 = pmov %p3177_p2 }
  0x9e   : > { %p461_p1 = scmp.lt.s32.totalorder %s2623_s13, 1  ;;  %v479_v0 = vld [vmem:[#allocation7] sm:$0xff]  ;;  %v480_v1 = vld [vmem:[#allocation7 + $0x8] sm:$0xff]  ;;  %v481_v2 = vld [vmem:[#allocation7 + $0x10] sm:$0xff]  ;;  %vm570_vm0 = vcmask 261120   ;;  %s2545_s27 = smov 96  }
  0x9f   : > { %2514 = vsyncadd (%p3178_p12), [#allocation9], 4294965248  ;;  %v2038_v3 = vpack.c.bf16 %v480_v1, %v479_v0  ;;  %v482_v4 = vld [vmem:[#allocation7 + $0x18] sm:$0xff]  ;;  %v483_v6 = vld [vmem:[#allocation7 + $0x20] sm:$0xff]  ;;  %vm664_vm3 = vcmask 130048   ;;  %s2546_s25 = smov 64  }
  0xa0   : > { %s2850_s19 = scalar_select %p461_p1, %s2623_s13, 1  ;;  %v2042_v5 = vpack.c.bf16 %v482_v4, %v481_v2  ;;  %v484_v7 = vld [vmem:[#allocation7 + $0x28] sm:$0xff]  ;;  %v485_v10 = vld [vmem:[#allocation7 + $0x30] sm:$0xff]  ;;  %v486_v11 = vld [vmem:[#allocation7 + $0x38] sm:$0xff]  ;;  %vm1420_vm5 = vcmask 523264   ;;  %vm1423_vm6 = vcmask 785408  }
  0xa1   : > { %2039 = vmatprep.subr.bf16.mxu0 %v2038_v3  ;;  %v2046_v8 = vpack.c.bf16 %v484_v7, %v483_v6  ;;  %v473_v12 = vld [vmem:[%s389_s28] sm:$0xff]  ;;  %v474_v13 = vld [vmem:[%s389_s28 + $0x8] sm:$0xff]  ;;  %vm2870_vm1 = vmpackc.low %vm570_vm0, %vm570_vm0  ;;  %v2050_v16 = vpack.c.bf16 %v486_v11, %v485_v10  ;;  %s2547_s1 = smov 32   ;;  %s3015_s24 = scalar_lea.vmem [#allocation11], %s2826_s22 }
  0xa2   : > { %s1840_s15 = sshll.u32 %s2850_s19, 4  ;;  %2041 = vmatpush3.bf16.msra.mxu0 %v2038_v3  ;;  %v2070_v15 = vpack.c.bf16 %v474_v13, %v473_v12  ;;  %v487_v17 = vld [vmem:[#allocation7 + $0x40] sm:$0xff]  ;;  %v488_v18 = vld [vmem:[#allocation7 + $0x48] sm:$0xff]  ;;  %v489_v20 = vld [vmem:[#allocation7 + $0x50] sm:$0xff]  ;;  %v2909_v42 = vpack.i.bf16 %v474_v13, %v473_v12  ;;  %s1842_s28 = sshll.u32 %s2623_s13, 8 }
  0xa3   : > { %s2858_s11 = scalar_lea.vmem %s3137_s0, %s1840_s15  ;;  %2043 = vmatprep.subr.bf16.mxu0 %v2042_v5  ;;  %v2054_v19 = vpack.c.bf16 %v488_v18, %v487_v17  ;;  %v490_v21 = vld [vmem:[#allocation7 + $0x58] sm:$0xff]  ;;  %v491_v23 = vld [vmem:[#allocation7 + $0x60] sm:$0xff]  ;;  %v492_v24 = vld [vmem:[#allocation7 + $0x68] sm:$0xff]  ;;  %s470_s16 = scalar_lea.vmem %s3140_s3, %s1840_s15 }
  0xa4   : > { %v2861_v9 = vld [vmem:[%s2858_s11] sm:$0xff]  ;;  %2072 = vmatprep.subr.msk.bf16.mxu1 %vm2870_vm1, %v2070_v15  ;;  %v2058_v22 = vpack.c.bf16 %v490_v21, %v489_v20  ;;  %v2062_v25 = vpack.c.bf16 %v492_v24, %v491_v23  ;;  %v493_v26 = vld [vmem:[#allocation7 + $0x70] sm:$0xff]  ;;  %v494_v27 = vld [vmem:[#allocation7 + $0x78] sm:$0xff]  ;;  %s1611_s19 = sshll.u32 %s3015_s24, 4  ;;  %s1582_s15 = scalar_lea.sflag [#allocation12], %s2823_s18  ;;  %s3045_s19 = int_to_ptr.vmem [resolvable:$true] %s1611_s19 }
  0xa5   : > { %1944 = vmatprep.mubr.f32.mxu0 %v2861_v9  ;;  %2075 = vmatpush3.bf16.xpose.msk.msra.mxu1 %vm2870_vm1, %v2070_v15  ;;  %v2066_v28 = vpack.c.bf16 %v494_v27, %v493_v26  ;;  %v2879_v29 = vld [vmem:[%s2858_s11 + $0x8] sm:$0xff]  ;;  %v2897_v32 = vld [vmem:[%s470_s16] sm:$0xff]  ;;  %s2427_s23 = scalar_lea.vmem %s3045_s19, 256  ;;  %p3181_p6 = scmp.ne.s32.totalorder %s3168_s26, 0 }
  0xa6   : > { %2045 = vmatpush3.bf16.msra.mxu0 %v2042_v5  ;;  %v2899_v33 = vld [vmem:[%s470_s16 + $0x8] sm:$0xff]  ;;  %vm660_vm2 = vcmp.gt.f32.partialorder %v2897_v32, 0.0  ;;  %v475_v53 = vld [vmem:[%s398_s14] sm:$0xff]  ;;  %p2428_p13 = scmp.ne.s32.totalorder %s3045_s19, %s2427_s23  ;;  %s2548_s21 = smov [#allocation11]  }
  0xa7   : > { %2047 = vmatprep.subr.bf16.mxu0 %v2046_v8  ;;  %vm661_vm4 = vcmp.gt.f32.partialorder %v2899_v33, 0.0  ;;  %v476_v54 = vld [vmem:[%s398_s14 + $0x8] sm:$0xff]  ;;  %s3042_s14 = scalar_lea.hbm %s3146_s9, %s1842_s28  ;;  %s2431_s11 = sshll.u32 %s2548_s21, 4  ;;  %s2432_s11 = int_to_ptr.vmem [resolvable:$false] %s2431_s11 }
  0xa8   : > { %v2076_v55 = vpack.c.bf16 %v476_v54, %v475_v53  ;;  %p2429_p10 = pnand %p2428_p13, %p3181_p6  ;;  %p2434_p5 = scmp.lt.s32.totalorder %s3045_s19, %s2432_s11 }
  0xaa   : > { %2049 = vmatpush3.bf16.msra.mxu0 %v2046_v8  ;;  %2077 = vmatprep.subr.bf16.mxu1 %v2076_v55  ;;  %p2430_p4 = pneg %p2429_p10 }
  0xab   : > { %2051 = vmatprep.subr.bf16.mxu0 %v2050_v16 }
  0xae   : > { %2053 = vmatpush3.bf16.msra.mxu0 %v2050_v16  ;;  %v2945_v16 = vpack.i.bf16 %v476_v54, %v475_v53 }
  0xaf   : > { %2055 = vmatprep.subr.bf16.mxu0 %v2054_v19 }
  0xb2   : > { %2057 = vmatpush3.bf16.msra.mxu0 %v2054_v19 }
  0xb3   : > { %2059 = vmatprep.subr.bf16.mxu0 %v2058_v22 }
  0xb6   : > { %2061 = vmatpush3.bf16.msra.mxu0 %v2058_v22 }
  0xb7   : > { %2063 = vmatprep.subr.bf16.mxu0 %v2062_v25 }
  0xba   : > { %2065 = vmatpush3.bf16.msra.mxu0 %v2062_v25 }
  0xbb   : > { %2067 = vmatprep.subr.bf16.mxu0 %v2066_v28 }
  0xbe   : > { %2069 = vmatpush3.bf16.msra.mxu0 %v2066_v28 }
  0xc1   : > { %1945 = vmatmul.mubr.f32.vlgmr.msra.gmra.mrb[0].mxu0 %v2879_v29 }
 0x194   : > { %v2882_v30 = vpop.f32.mrb[0].mxu0 }
 0x195   : > { %v2884_v31 = vpop.f32.mrb[1].mxu0 }
 0x196   : > { %770 = vrot.lane.b32.xlu1 %v2884_v31, %s2545_s27  ;;  %1951 = vmatprep.mubr.msk.f32.mxu1 %vm570_vm0, %v2884_v31 }
 0x197   : > { %1952 = vmatmul.mubr.msk.f32.vlgmr.msra.gmra.mrb[0].mxu1 %vm570_vm0, %v2882_v30 }
 0x198   : > { %2079 = vmatpush3.bf16.msra.mxu1 %v2076_v55 }
 0x208   : > { %v771_v60 = vpop.permute.xlu1 %770 }
 0x26a   : > { %v1953_v34 = vpop.f32.mrb[0].mxu1 }
 0x26b   : > { %v649_v35 = vpop.f32.mrb[1].mxu1  ;;  %v659_v36 = vmul.f32 0.17677669, %v1953_v34 }
 0x26c   : > { %v658_v37 = vmul.f32 0.17677669, %v649_v35 }
 0x26d   : > { %v663_v40 = vsel %vm661_vm4, -inf, %v659_v36 }
 0x26e   : > { %v662_v38 = vsel %vm660_vm2, -inf, %v658_v37  ;;  %v668_v41 = vsel %vm664_vm3, %v663_v40, -inf }
 0x26f   : > { %v665_v39 = vsel %vm664_vm3, %v662_v38, -inf }
 0x270   : > { %666 = vmax.xlane.f32.xlu0 %v665_v39 }
 0x274   : > { %669 = vmax.xlane.f32.xlu0 %v668_v41 }
 0x28a   : > { %2227 = vrot.lane.b32.xlu0 %v2909_v42, %s2545_s27 }
 0x2fd   : > { %v667_v43 = vpop.xlane.xlu0 %666 }
 0x2fe   : > { %v671_v44 = vsub.f32 %v662_v38, %v667_v43 }
 0x300   : > { %v673_v47 = vmul.f32 1.442695, %v671_v44 }
 0x301   : > { %v670_v45 = vpop.xlane.xlu0 %669 }
 0x302   : > { %v672_v46 = vsub.f32 %v663_v40, %v670_v45 }
 0x304   : > { %v675_v48 = vmul.f32 1.442695, %v672_v46 }
 0x305   : > { %v2228_v56 = vpop.permute.xlu0 %2227 }
 0x306   : > { %2271 = vpow2.f32 %v675_v48  ;;  %v2230_v57 = vunpack.i.h.bf16 %v2228_v56  ;;  %v2229_v58 = vunpack.i.l.bf16 %v2228_v56 }
 0x307   : > { %2273 = vpow2.f32 %v673_v47 }
 0x308   : > { %v2080_v59 = vpack.c.bf16 %v2230_v57, %v2229_v58 }
 0x30a   : > { %2082 = vmatprep.subr.msk.bf16.mxu1 %vm2870_vm1, %v2080_v59 }
 0x310   : > { %v2272_v49 = vpop.eup %2271 }
 0x311   : > { %v680_v50 = vsel %vm664_vm3, %v2272_v49, 0.0  ;;  %v2274_v51 = vpop.eup %2273 }
 0x312   : > { %681 = vadd.xlane.f32.xlu1 %v680_v50  ;;  %v677_v52 = vsel %vm664_vm3, %v2274_v51, 0.0 }
 0x316   : > { %678 = vadd.xlane.f32.xlu1 %v677_v52 }
 0x327   : > { %772 = vrot.lane.b32.xlu1 %v2882_v30, %s2545_s27 }
 0x39f   : > { %v682_v61 = vpop.xlane.xlu1 %681 }
 0x3a0   : > { %2275 = vrcp.f32 %v682_v61 }
 0x3a3   : > { %v679_v62 = vpop.xlane.xlu1 %678 }
 0x3a4   : > { %2277 = vrcp.f32 %v679_v62 }
 0x3a7   : > { %v773_v3 = vpop.permute.xlu1 %772 }
 0x3aa   : > { %v2276_v63 = vpop.eup %2275 }
 0x3ab   : > { %v2925_v2 = vmul.f32 %v2276_v63, %v2272_v49 }
 0x3ae   : > { %v2278_v0 = vpop.eup %2277 }
 0x3af   : > { %v2923_v1 = vmul.f32 %v2278_v0, %v2274_v51 }
 0x3b1   : > { %1958 = vmatprep.mubr.msk.f32.mxu1 %vm664_vm3, %v2923_v1 }
 0x3b2   : > { %1959 = vmatmul.mubr.msk.f32.vlgmr.msra.gmra.mrb[2].mxu1 %vm664_vm3, %v2925_v2 }
 0x3b3   : > { %2085 = vmatpush3.bf16.xpose.msk.msra.mxu1 %vm2870_vm1, %v2080_v59  ;;  %1965 = vmatprep.mubr.msk.f32.mxu1 %vm570_vm0, %v771_v60 }
 0x3ba   : > { %1966 = vmatmul.mubr.msk.f32.vlgmr.msra.gmra.mrb[4].mxu1 %vm570_vm0, %v773_v3 }
 0x485   : > { %v2935_v4 = vpop.f32.mrb[2].mxu1 }
 0x486   : > { %v2937_v5 = vpop.f32.mrb[3].mxu1 }
 0x48d   : > { %v1967_v6 = vpop.f32.mrb[4].mxu1 }
 0x48e   : > { %v862_v7 = vmul.f32 0.17677669, %v1967_v6  ;;  %v852_v8 = vpop.f32.mrb[5].mxu1 }
 0x48f   : > { %v861_v10 = vmul.f32 0.17677669, %v852_v8 }
 0x490   : > { %v864_v11 = vsel %vm661_vm4, -inf, %v862_v7 }
 0x491   : > { %v868_v12 = vsel %vm664_vm3, %v864_v11, -inf  ;;  %v863_v13 = vsel %vm660_vm2, -inf, %v861_v10 }
 0x492   : > { %869 = vmax.xlane.f32.xlu0 %v868_v12  ;;  %v865_v15 = vsel %vm664_vm3, %v863_v13, -inf }
 0x493   : > { %866 = vmax.xlane.f32.xlu1 %v865_v15 }
 0x4a4   : > { %2232 = vrot.lane.b32.xlu1 %v2945_v16, %s2545_s27 }
 0x4a8   : > { %978 = vrot.lane.b32.xlu1 %v2884_v31, %s2546_s25 }
 0x4ac   : > { %980 = vrot.lane.b32.xlu1 %v2882_v30, %s2546_s25 }
 0x51f   : > { %v870_v17 = vpop.xlane.xlu0 %869 }
 0x520   : > { %v872_v18 = vsub.f32 %v864_v11, %v870_v17  ;;  %v867_v19 = vpop.xlane.xlu1 %866 }
 0x521   : > { %v871_v20 = vsub.f32 %v863_v13, %v867_v19 }
 0x522   : > { %v875_v21 = vmul.f32 1.442695, %v872_v18 }
 0x523   : > { %v873_v22 = vmul.f32 1.442695, %v871_v20 }
 0x524   : > { %2279 = vpow2.f32 %v875_v21  ;;  %v2233_v23 = vpop.permute.xlu1 %2232 }
 0x525   : > { %v2235_v24 = vunpack.i.h.bf16 %v2233_v23  ;;  %v2234_v25 = vunpack.i.l.bf16 %v2233_v23  ;;  %2281 = vpow2.f32 %v873_v22 }
 0x527   : > { %v2086_v26 = vpack.c.bf16 %v2235_v24, %v2234_v25 }
 0x528   : > { %v979_v47 = vpop.permute.xlu1 %978 }
 0x529   : > { %2087 = vmatprep.subr.bf16.mxu1 %v2086_v26 }
 0x52a   : > { %2089 = vmatpush3.bf16.msra.mxu1 %v2086_v26 }
 0x52c   : > { %v981_v48 = vpop.permute.xlu1 %980 }
 0x52e   : > { %v2280_v27 = vpop.eup %2279 }
 0x52f   : > { %v880_v28 = vsel %vm664_vm3, %v2280_v27, 0.0  ;;  %v2282_v34 = vpop.eup %2281 }
 0x530   : > { %881 = vadd.xlane.f32.xlu0 %v880_v28  ;;  %v877_v35 = vsel %vm664_vm3, %v2282_v34, 0.0 }
 0x534   : > { %878 = vadd.xlane.f32.xlu0 %v877_v35 }
 0x54a   : > { %2237 = vrot.lane.b32.xlu0 %v2909_v42, %s2546_s25 }
 0x5bd   : > { %v882_v36 = vpop.xlane.xlu0 %881 }
 0x5be   : > { %2283 = vrcp.f32 %v882_v36 }
 0x5c1   : > { %v879_v37 = vpop.xlane.xlu0 %878 }
 0x5c2   : > { %2285 = vrcp.f32 %v879_v37 }
 0x5c5   : > { %v2238_v38 = vpop.permute.xlu0 %2237 }
 0x5c6   : > { %v2240_v39 = vunpack.i.h.bf16 %v2238_v38  ;;  %v2239_v40 = vunpack.i.l.bf16 %v2238_v38 }
 0x5c8   : > { %v2090_v41 = vpack.c.bf16 %v2240_v39, %v2239_v40  ;;  %v2284_v43 = vpop.eup %2283 }
 0x5c9   : > { %v886_v46 = vmul.f32 %v2284_v43, %v2280_v27 }
 0x5ca   : > { %2092 = vmatprep.subr.msk.bf16.mxu1 %vm2870_vm1, %v2090_v41 }
 0x5cb   : > { %v888_v22 = vadd.f32 %v886_v46, %v2925_v2 }
 0x5cc   : > { %v2286_v44 = vpop.eup %2285 }
 0x5cd   : > { %v884_v45 = vmul.f32 %v2286_v44, %v2282_v34 }
 0x5cf   : > { %1972 = vmatprep.mubr.msk.f32.mxu1 %vm664_vm3, %v884_v45  ;;  %v887_v26 = vadd.f32 %v884_v45, %v2923_v1 }
 0x5d0   : > { %1973 = vmatmul.mubr.msk.f32.vlgmr.msra.gmra.mrb[6].mxu1 %vm664_vm3, %v886_v46 }
 0x5d1   : > { %2095 = vmatpush3.bf16.xpose.msk.msra.mxu1 %vm2870_vm1, %v2090_v41  ;;  %1979 = vmatprep.mubr.msk.f32.mxu1 %vm570_vm0, %v979_v47 }
 0x5d8   : > { %1980 = vmatmul.mubr.msk.f32.vlgmr.msra.gmra.mrb[8].mxu1 %vm570_vm0, %v981_v48 }
 0x6a3   : > { %v2965_v49 = vpop.f32.mrb[6].mxu1 }
 0x6a4   : > { %v2967_v50 = vpop.f32.mrb[7].mxu1 }
 0x6a5   : > { %v2256_v51 = vpack.i.bf16 %v2965_v49, %v2967_v50  ;;  %v1426_v50 = vld [vmem:[#allocation8] sm:$0xff] }
 0x6ab   : > { %v1981_v52 = vpop.f32.mrb[8].mxu1 }
 0x6ac   : > { %v1070_v53 = vmul.f32 0.17677669, %v1981_v52  ;;  %v1060_v54 = vpop.f32.mrb[9].mxu1 }
 0x6ad   : > { %v1069_v55 = vmul.f32 0.17677669, %v1060_v54 }
 0x6ae   : > { %v1072_v56 = vsel %vm661_vm4, -inf, %v1070_v53 }
 0x6af   : > { %v1076_v57 = vsel %vm664_vm3, %v1072_v56, -inf  ;;  %v1071_v58 = vsel %vm660_vm2, -inf, %v1069_v55 }
 0x6b0   : > { %1077 = vmax.xlane.f32.xlu0 %v1076_v57  ;;  %v1073_v59 = vsel %vm664_vm3, %v1071_v58, -inf }
 0x6b1   : > { %1074 = vmax.xlane.f32.xlu1 %v1073_v59 }
 0x6c2   : > { %2242 = vrot.lane.b32.xlu1 %v2945_v16, %s2546_s25 }
 0x6c6   : > { %1184 = vrot.lane.b32.xlu1 %v2884_v31, %s2547_s1 }
 0x6ca   : > { %1186 = vrot.lane.b32.xlu1 %v2882_v30, %s2547_s1 }
 0x73d   : > { %v1078_v60 = vpop.xlane.xlu0 %1077 }
 0x73e   : > { %v1080_v61 = vsub.f32 %v1072_v56, %v1078_v60  ;;  %v1075_v62 = vpop.xlane.xlu1 %1074 }
 0x73f   : > { %v1079_v63 = vsub.f32 %v1071_v58, %v1075_v62 }
 0x740   : > { %v1083_v0 = vmul.f32 1.442695, %v1080_v61 }
 0x741   : > { %v1081_v3 = vmul.f32 1.442695, %v1079_v63 }
 0x742   : > { %2287 = vpow2.f32 %v1083_v0  ;;  %v2243_v6 = vpop.permute.xlu1 %2242 }
 0x743   : > { %v2245_v7 = vunpack.i.h.bf16 %v2243_v6  ;;  %v2244_v8 = vunpack.i.l.bf16 %v2243_v6  ;;  %2289 = vpow2.f32 %v1081_v3 }
 0x745   : > { %v2096_v10 = vpack.c.bf16 %v2245_v7, %v2244_v8  ;;  %v1428_v7 = vld [vmem:[#allocation8 + $0x10] sm:$0xff] }
 0x746   : > { %v1185_v28 = vpop.permute.xlu1 %1184 }
 0x747   : > { %2097 = vmatprep.subr.bf16.mxu1 %v2096_v10 }
 0x748   : > { %2099 = vmatpush3.bf16.msra.mxu1 %v2096_v10  ;;  %v1429_v10 = vld [vmem:[#allocation8 + $0x18] sm:$0xff] }
 0x74a   : > { %v1187_v2 = vpop.permute.xlu1 %1186 }
 0x74c   : > { %v2288_v11 = vpop.eup %2287 }
 0x74d   : > { %v1088_v31 = vsel %vm664_vm3, %v2288_v11, 0.0  ;;  %v2290_v12 = vpop.eup %2289 }
 0x74e   : > { %1089 = vadd.xlane.f32.xlu0 %v1088_v31  ;;  %v1085_v30 = vsel %vm664_vm3, %v2290_v12, 0.0  ;;  %v1430_v31 = vld [vmem:[#allocation8 + $0x20] sm:$0xff] }
 0x752   : > { %1086 = vadd.xlane.f32.xlu0 %v1085_v30 }
 0x768   : > { %2247 = vrot.lane.b32.xlu0 %v2909_v42, %s2547_s1 }
 0x7db   : > { %v1090_v13 = vpop.xlane.xlu0 %1089 }
 0x7dc   : > { %2291 = vrcp.f32 %v1090_v13  ;;  %v1432_v13 = vld [vmem:[#allocation8 + $0x30] sm:$0xff] }
 0x7df   : > { %v1087_v15 = vpop.xlane.xlu0 %1086 }
 0x7e0   : > { %2293 = vrcp.f32 %v1087_v15  ;;  %v1433_v15 = vld [vmem:[#allocation8 + $0x38] sm:$0xff] }
 0x7e3   : > { %v2248_v17 = vpop.permute.xlu0 %2247 }
 0x7e4   : > { %v2250_v18 = vunpack.i.h.bf16 %v2248_v17  ;;  %v2249_v19 = vunpack.i.l.bf16 %v2248_v17  ;;  %v2122_v17 = vpack.c.bf16 %v1433_v15, %v1432_v13 }
 0x7e6   : > { %v2292_v20 = vpop.eup %2291  ;;  %v2100_v21 = vpack.c.bf16 %v2250_v18, %v2249_v19  ;;  %v1434_v18 = vld [vmem:[#allocation8 + $0x40] sm:$0xff]  ;;  %v1435_v19 = vld [vmem:[#allocation8 + $0x48] sm:$0xff] }
 0x7e7   : > { %v1094_v23 = vmul.f32 %v2292_v20, %v2288_v11  ;;  %v2114_v11 = vpack.c.bf16 %v1429_v10, %v1428_v7  ;;  %v2126_v20 = vpack.c.bf16 %v1435_v19, %v1434_v18 }
 0x7e8   : > { %2102 = vmatprep.subr.msk.bf16.mxu1 %vm2870_vm1, %v2100_v21 }
 0x7e9   : > { %v1096_v24 = vadd.f32 %v1094_v23, %v888_v22  ;;  %v1437_v22 = vld [vmem:[#allocation8 + $0x58] sm:$0xff] }
 0x7ea   : > { %v2294_v25 = vpop.eup %2293 }
 0x7eb   : > { %v1092_v42 = vmul.f32 %v2294_v25, %v2290_v12  ;;  %v1431_v12 = vld [vmem:[#allocation8 + $0x28] sm:$0xff] }
 0x7ec   : > { %v2118_v30 = vpack.c.bf16 %v1431_v12, %v1430_v31  ;;  %v1439_v25 = vld [vmem:[#allocation8 + $0x68] sm:$0xff] }
 0x7ed   : > { %v1095_v27 = vadd.f32 %v1092_v42, %v887_v26  ;;  %1986 = vmatprep.mubr.msk.f32.mxu1 %vm664_vm3, %v1092_v42  ;;  %v1440_v42 = vld [vmem:[#allocation8 + $0x70] sm:$0xff] }
 0x7ee   : > { %1987 = vmatmul.mubr.msk.f32.vlgmr.msra.gmra.mrb[10].mxu1 %vm664_vm3, %v1094_v23 }
 0x7ef   : > { %2105 = vmatpush3.bf16.xpose.msk.msra.mxu1 %vm2870_vm1, %v2100_v21  ;;  %1993 = vmatprep.mubr.msk.f32.mxu1 %vm570_vm0, %v1185_v28  ;;  %v1436_v21 = vld [vmem:[#allocation8 + $0x50] sm:$0xff] }
 0x7f0   : > { %v2130_v23 = vpack.c.bf16 %v1437_v22, %v1436_v21 }
 0x7f6   : > { %1994 = vmatmul.mubr.msk.f32.vlgmr.msra.gmra.mrb[12].mxu1 %vm570_vm0, %v1187_v2 }
 0x8c1   : > { %v1988_v34 = vpop.f32.mrb[10].mxu1 }
 0x8c2   : > { %v1175_v35 = vpop.f32.mrb[11].mxu1 }
 0x8c3   : > { %v2261_v36 = vpack.i.bf16 %v1988_v34, %v1175_v35 }
 0x8c9   : > { %v1995_v37 = vpop.f32.mrb[12].mxu1 }
 0x8ca   : > { %v1276_v1 = vmul.f32 0.17677669, %v1995_v37  ;;  %v1266_v38 = vpop.f32.mrb[13].mxu1 }
 0x8cb   : > { %v1275_v39 = vmul.f32 0.17677669, %v1266_v38 }
 0x8cc   : > { %v1278_v40 = vsel %vm661_vm4, -inf, %v1276_v1 }
 0x8cd   : > { %v1282_v41 = vsel %vm664_vm3, %v1278_v40, -inf  ;;  %v1277_v14 = vsel %vm660_vm2, -inf, %v1275_v39 }
 0x8ce   : > { %1283 = vmax.xlane.f32.xlu0 %v1282_v41  ;;  %v1279_v43 = vsel %vm664_vm3, %v1277_v14, -inf }
 0x8cf   : > { %1280 = vmax.xlane.f32.xlu1 %v1279_v43 }
 0x8e0   : > { %2252 = vrot.lane.b32.xlu1 %v2945_v16, %s2547_s1 }
 0x8e4   : > { %2262 = vrot.lane.b32.xlu1 %v2261_v36, %s2546_s25 }
 0x95b   : > { %v1284_v44 = vpop.xlane.xlu0 %1283 }
 0x95c   : > { %v1286_v45 = vsub.f32 %v1278_v40, %v1284_v44  ;;  %v1281_v46 = vpop.xlane.xlu1 %1280 }
 0x95d   : > { %v1285_v47 = vsub.f32 %v1277_v14, %v1281_v46 }
 0x95e   : > { %v1289_v33 = vmul.f32 1.442695, %v1286_v45 }
 0x95f   : > { %v1287_v48 = vmul.f32 1.442695, %v1285_v47 }
 0x960   : > { %v2253_v52 = vpop.permute.xlu1 %2252 }
 0x961   : > { %2295 = vpow2.f32 %v1287_v48  ;;  %v2255_v53 = vunpack.i.h.bf16 %v2253_v52  ;;  %v2254_v32 = vunpack.i.l.bf16 %v2253_v52 }
 0x962   : > { %2297 = vpow2.f32 %v1289_v33 }
 0x963   : > { %v2106_v54 = vpack.c.bf16 %v2255_v53, %v2254_v32 }
 0x964   : > { %v2263_v38 = vpop.permute.xlu1 %2262 }
 0x965   : > { %2107 = vmatprep.subr.bf16.mxu1 %v2106_v54  ;;  %v2265_v41 = vunpack.i.h.bf16 %v2263_v38  ;;  %v2264_v14 = vunpack.i.l.bf16 %v2263_v38 }
 0x966   : > { %2109 = vmatpush3.bf16.msra.mxu1 %v2106_v54 }
 0x96b   : > { %v2296_v55 = vpop.eup %2295 }
 0x96c   : > { %v1291_v56 = vsel %vm664_vm3, %v2296_v55, 0.0  ;;  %v2298_v16 = vpop.eup %2297 }
 0x96d   : > { %1292 = vadd.xlane.f32.xlu0 %v1291_v56  ;;  %v1294_v57 = vsel %vm664_vm3, %v2298_v16, 0.0 }
 0x971   : > { %1295 = vadd.xlane.f32.xlu0 %v1294_v57 }
 0x987   : > { %2257 = vrot.lane.b32.xlu0 %v2256_v51, %s2547_s1  ;;  %v1427_v51 = vld [vmem:[#allocation8 + $0x8] sm:$0xff] }
 0x988   : > { %v2110_v8 = vpack.c.bf16 %v1427_v51, %v1426_v50 }
 0x98a   : > { %2111 = vmatprep.subr.bf16.mxu0 %v2110_v8 }
 0x98b   : > { %2113 = vmatpush3.bf16.msra.mxu0 %v2110_v8 }
 0x98c   : > { %2115 = vmatprep.subr.bf16.mxu0 %v2114_v11 }
 0x98f   : > { %2117 = vmatpush3.bf16.msra.mxu0 %v2114_v11 }
 0x990   : > { %2119 = vmatprep.subr.bf16.mxu0 %v2118_v30 }
 0x993   : > { %2121 = vmatpush3.bf16.msra.mxu0 %v2118_v30 }
 0x994   : > { %2123 = vmatprep.subr.bf16.mxu0 %v2122_v17 }
 0x997   : > { %2125 = vmatpush3.bf16.msra.mxu0 %v2122_v17 }
 0x998   : > { %2127 = vmatprep.subr.bf16.mxu0 %v2126_v20 }
 0x99b   : > { %2129 = vmatpush3.bf16.msra.mxu0 %v2126_v20 }
 0x99c   : > { %2131 = vmatprep.subr.bf16.mxu0 %v2130_v23 }
 0x99f   : > { %2133 = vmatpush3.bf16.msra.mxu0 %v2130_v23 }
 0x9fa   : > { %v1293_v58 = vpop.xlane.xlu0 %1292 }
 0x9fb   : > { %2299 = vrcp.f32 %v1293_v58 }
 0x9fe   : > { %v1296_v59 = vpop.xlane.xlu0 %1295 }
 0x9ff   : > { %2301 = vrcp.f32 %v1296_v59 }
 0xa02   : > { %v2258_v36 = vpop.permute.xlu0 %2257 }
 0xa03   : > { %v2260_v37 = vunpack.i.h.bf16 %v2258_v36  ;;  %v2259_v1 = vunpack.i.l.bf16 %v2258_v36 }
 0xa05   : > { %v2300_v60 = vpop.eup %2299  ;;  %v1419_v39 = vsel %vm570_vm0, %v2935_v4, %v2260_v37  ;;  %v1418_v40 = vsel %vm570_vm0, %v2937_v5, %v2259_v1 }
 0xa06   : > { %v1298_v61 = vmul.f32 %v2300_v60, %v2296_v55  ;;  %v1421_v46 = vsel %vm1420_vm5, %v1418_v40, %v2264_v14  ;;  %v1422_v47 = vsel %vm1420_vm5, %v1419_v39, %v2265_v41 }
 0xa08   : > { %v1301_v62 = vadd.f32 %v1298_v61, %v1095_v27  ;;  %2000 = vmatprep.mubr.msk.f32.mxu1 %vm664_vm3, %v1298_v61  ;;  %v1441_v27 = vld [vmem:[#allocation8 + $0x78] sm:$0xff] }
 0xa09   : > { %v2302_v63 = vpop.eup %2301  ;;  %v2138_v28 = vpack.c.bf16 %v1441_v27, %v1440_v42 }
 0xa0a   : > { %v1300_v0 = vmul.f32 %v2302_v63, %v2298_v16  ;;  %v1390_v3 = vmul.f32 0.25, %v1301_v62 }
 0xa0c   : > { %v1302_v6 = vadd.f32 %v1300_v0, %v1096_v24  ;;  %2001 = vmatmul.mubr.msk.f32.vlgmr.msra.gmra.mrb[14].mxu1 %vm664_vm3, %v1300_v0  ;;  %1392 = vst.msk [vmem:[%s3015_s24] sm:$0xff] %vm664_vm3, %v1390_v3  ;;  %v1438_v24 = vld [vmem:[#allocation8 + $0x60] sm:$0xff] }
 0xa0d   : > { %v2134_v26 = vpack.c.bf16 %v1439_v25, %v1438_v24 }
 0xa0e   : > { %v1391_v49 = vmul.f32 0.25, %v1302_v6 }
 0xa0f   : > { %2135 = vmatprep.subr.bf16.mxu0 %v2134_v26 }
 0xa10   : > { %1393 = vst.msk [vmem:[%s3015_s24 + $0x8] sm:$0xff] %vm664_vm3, %v1391_v49  ;;  %2137 = vmatpush3.bf16.msra.mxu0 %v2134_v26 }
 0xa11   : > { %2139 = vmatprep.subr.bf16.mxu0 %v2138_v28 }
 0xa14   : > { %2141 = vmatpush3.bf16.msra.mxu0 %v2138_v28 }
 0xadf   : > { %v2002_v2 = vpop.f32.mrb[14].mxu1 }
 0xae0   : > { %v1381_v34 = vpop.f32.mrb[15].mxu1 }
 0xae1   : > { %v2266_v35 = vpack.i.bf16 %v2002_v2, %v1381_v34 }
 0xae3   : > { %2267 = vrot.lane.b32.xlu1 %v2266_v35, %s2545_s27  ;;  %s2433_s27 = scalar_lea.vmem %s2432_s11, 512 }
 0xae4   : > { %p2435_p3 = scmp.lt.s32.totalorder %s2433_s27, %s2427_s23 }
 0xae6   : > { %p2436_p7 = por %p2435_p3, %p2434_p5 }
 0xae8   : > { %p2437_p9 = pnand %p2436_p7, %p2430_p4 }
 0xb55   : > { %v2268_v43 = vpop.permute.xlu1 %2267 }
 0xb56   : > { %v2270_v44 = vunpack.i.h.bf16 %v2268_v43  ;;  %v2269_v45 = vunpack.i.l.bf16 %v2268_v43 }
 0xb58   : > { %v1424_v33 = vsel %vm1423_vm6, %v1421_v46, %v2269_v45  ;;  %v1425_v48 = vsel %vm1423_vm6, %v1422_v47, %v2270_v44 }
 0xb59   : > { %2035 = vmatprep.mubr.f32.mxu0 %v1424_v33 }
 0xb5a   : > { %2036 = vmatmul.mubr.f32.vlgmr.msra.gmra.mrb[2].mxu0 %v1425_v48 }
 0xc2d   : > { %v2037_v52 = vpop.f32.mrb[2].mxu0 }
 0xc2e   : > { %v1518_v4 = vadd.f32 %v2037_v52, %v2879_v29  ;;  %v1508_v53 = vpop.f32.mrb[3].mxu0 }
 0xc2f   : > { %v1517_v5 = vadd.f32 %v1508_v53, %v2861_v9 }
 0xc30   : > { %1521 = vadd.xlane.f32.xlu0 %v1518_v4 }
 0xc31   : > { %1519 = vadd.xlane.f32.xlu1 %v1517_v5 }
 0xcbd   : > { %v1522_v32 = vpop.xlane.xlu0 %1521 }
 0xcbe   : > { %v1520_v54 = vpop.xlane.xlu1 %1519  ;;  %v1525_v55 = vmul.f32 0.0078125, %v1522_v32 }
 0xcbf   : > { %v1524_v56 = vmul.f32 0.0078125, %v1520_v54 }
 0xcc0   : > { %v3030_v57 = vsub.f32 %v1518_v4, %v1525_v55 }
 0xcc1   : > { %v3028_v16 = vsub.f32 %v1517_v5, %v1524_v56 }
 0xcc2   : > { %v1529_v58 = vmul.f32 %v3030_v57, %v3030_v57 }
 0xcc3   : > { %v1528_v29 = vmul.f32 %v3028_v16, %v3028_v16 }
 0xcc5   : > { %1530 = vadd.xlane.f32.xlu0 %v1528_v29 }
 0xcc9   : > { %1532 = vadd.xlane.f32.xlu0 %v1529_v58 }
 0xcca   : > { %2440 = shalt.err (!%p2437_p9)
}
 0xccb   : > { %s2441_s29 = scalar_lea.hbm %s3042_s14, 256  ;;  %s2445_s25 = scalar_lea.hbm %s3146_s9, 512 }
 0xccc   : > { %p2442_p0 = scmp.ne.s32.totalorder %s3042_s14, %s2441_s29  ;;  %p2446_p2 = scmp.lt.u32.totalorder %s3042_s14, %s3146_s9 }
 0xccd   : > { %p2447_p12 = scmp.lt.u32.totalorder %s2445_s25, %s2441_s29  ;;  %p2449_p13 = scmp.lt.u32.totalorder %s2441_s29, %s3042_s14 }
 0xcce   : > { %p2443_p8 = pnand %p2442_p0, %p3181_p6 }
 0xccf   : > { %p2448_p1 = por %p2447_p12, %p2446_p2 }
 0xcd0   : > { %p2444_p11 = pneg %p2443_p8 }
 0xcd1   : > { %p2450_p10 = por %p2449_p13, %p2448_p1 }
 0xcd3   : > { %p2451_p4 = pnand %p2450_p10, %p2444_p11 }
 0xcd5   : > { %2454 = shalt.err (!%p2451_p4)
}
 0xcd6   : > { %s2549_s4 = smov 128   ;;  %s2550_s17 = smov 8   ;;  %v1828_v31 = vld [vmem:[%s3143_s6] ss:$0 sm:$0xff] }
 0xcd7   : > { %2155 = dma.vmem_to_hbm [thread:$0]  (%p3181_p6), %s3045_s19, 256, %s3042_s14, %s1582_s15, %s2549_s4, %s2549_s4, %s2550_s17   ;;  %v1557_v12 = vmul.f32 %v1828_v31, %v3028_v16  ;;  %v1558_v17 = vmul.f32 %v1828_v31, %v3030_v57 }
 0xcd8   : > { %v1829_v13 = vld [vmem:[%s3144_s7] ss:$0 sm:$0xff]  ;;  %s453_s21 = scalar_lea.vmem [#allocation10], %s2826_s22  ;;  %s3088_s5 = scalar_lea.hbm %s3145_s8, %s1842_s28 }
 0xcd9   : > { %s1595_s11 = sshll.u32 %s453_s21, 4  ;;  %s1577_s16 = scalar_lea.sflag [#allocation4], %s2823_s18  ;;  %s3090_s11 = int_to_ptr.vmem [resolvable:$true] %s1595_s11 }
 0xcda   : > { %s2455_s25 = scalar_lea.vmem %s3090_s11, 256  ;;  %s2551_s22 = smov [#allocation10]  }
 0xcdb   : > { %p2456_p5 = scmp.ne.s32.totalorder %s3090_s11, %s2455_s25  ;;  %s2459_s1 = sshll.u32 %s2551_s22, 4  ;;  %s2460_s1 = int_to_ptr.vmem [resolvable:$false] %s2459_s1 }
 0xcdc   : > { %s2461_s13 = scalar_lea.vmem %s2460_s1, 512  ;;  %p2462_p9 = scmp.lt.s32.totalorder %s3090_s11, %s2460_s1 }
 0xcdd   : > { %p2457_p3 = pnand %p2456_p5, %p3181_p6  ;;  %p2463_p0 = scmp.lt.s32.totalorder %s2461_s13, %s2455_s25 }
 0xcdf   : > { %p2458_p7 = pneg %p2457_p3  ;;  %p2464_p8 = por %p2463_p0, %p2462_p9 }
 0xce1   : > { %p2465_p11 = pnand %p2464_p8, %p2458_p7 }
 0xd52   : > { %v1531_v9 = vpop.xlane.xlu0 %1530 }
 0xd53   : > { %v1534_v59 = vmul.f32 0.007874016, %v1531_v9 }
 0xd55   : > { %2303 = vrsqrt.f32 %v1534_v59  ;;  %vm1538_vm7 = vcmp.eq.f32.partialorder %v1534_v59, inf  ;;  %v1541_v0 = vand.u32 2147483648, %v1534_v59  ;;  %vm1540_vm8 = vcmp.eq.f32.partialorder %v1534_v59, 0.0 }
 0xd56   : > { %v1533_v60 = vpop.xlane.xlu0 %1532 }
 0xd57   : > { %v1535_v61 = vmul.f32 0.007874016, %v1533_v60 }
 0xd59   : > { %2305 = vrsqrt.f32 %v1535_v61  ;;  %vm1545_vm9 = vcmp.eq.f32.partialorder %v1535_v61, inf  ;;  %v1548_v7 = vand.u32 2147483648, %v1535_v61  ;;  %vm1547_vm10 = vcmp.eq.f32.partialorder %v1535_v61, 0.0 }
 0xd5f   : > { %v2304_v62 = vpop.eup %2303 }
 0xd60   : > { %v1537_v63 = vmul.f32 %v2304_v62, %v1534_v59 }
 0xd62   : > { %v1539_v3 = vsel %vm1538_vm7, %v1534_v59, %v1537_v63 }
 0xd63   : > { %v2306_v6 = vpop.eup %2305  ;;  %v1542_v49 = vsel %vm1540_vm8, %v1541_v0, %v1539_v3 }
 0xd64   : > { %v1559_v50 = vadd.f32 1e-06, %v1542_v49  ;;  %v1544_v51 = vmul.f32 %v2306_v6, %v1535_v61 }
 0xd66   : > { %2307 = vrcp.f32 %v1559_v50  ;;  %v1546_v8 = vsel %vm1545_vm9, %v1535_v61, %v1544_v51 }
 0xd67   : > { %v1549_v10 = vsel %vm1547_vm10, %v1548_v7, %v1546_v8 }
 0xd68   : > { %v1560_v11 = vadd.f32 1e-06, %v1549_v10 }
 0xd6a   : > { %2309 = vrcp.f32 %v1560_v11 }
 0xd70   : > { %v2308_v30 = vpop.eup %2307 }
 0xd71   : > { %v1562_v15 = vmul.f32 %v2308_v30, %v1557_v12 }
 0xd73   : > { %v1572_v18 = vadd.f32 %v1829_v13, %v1562_v15 }
 0xd74   : > { %v2310_v19 = vpop.eup %2309 }
 0xd75   : > { %v1564_v20 = vmul.f32 %v2310_v19, %v1558_v17  ;;  %1574 = vst [vmem:[%s453_s21] sm:$0xff] %v1572_v18 }
 0xd77   : > { %v1573_v21 = vadd.f32 %v1829_v13, %v1564_v20 }
 0xd79   : > { %1575 = vst [vmem:[%s453_s21 + $0x8] sm:$0xff] %v1573_v21 }
 0xd7a   : > { %2468 = shalt.err (!%p2465_p11)
}
 0xd7b   : > { %s2469_s28 = scalar_lea.hbm %s3088_s5, 256  ;;  %s2473_s19 = scalar_lea.hbm %s3145_s8, 512 }
 0xd7c   : > { %p2470_p2 = scmp.ne.s32.totalorder %s3088_s5, %s2469_s28  ;;  %p2474_p13 = scmp.lt.u32.totalorder %s3088_s5, %s3145_s8 }
 0xd7d   : > { %p2475_p10 = scmp.lt.u32.totalorder %s2473_s19, %s2469_s28  ;;  %p2477_p5 = scmp.lt.u32.totalorder %s2469_s28, %s3088_s5 }
 0xd7e   : > { %p2471_p12 = pnand %p2470_p2, %p3181_p6 }
 0xd7f   : > { %p2476_p4 = por %p2475_p10, %p2474_p13 }
 0xd80   : > { %p2472_p1 = pneg %p2471_p12 }
 0xd81   : > { %p2478_p3 = por %p2477_p5, %p2476_p4 }
 0xd83   : > { %p2479_p7 = pnand %p2478_p3, %p2472_p1 }
 0xd85   : > { %2482 = shalt.err (!%p2479_p7)
}
 0xd86   : > { %2154 = dma.vmem_to_hbm [thread:$0]  (%p3181_p6), %s3090_s11, 256, %s3088_s5, %s1577_s16, %s2549_s4, %s2549_s4, %s2550_s17  }
 0xd87 PF: > { %s3182_s21 = sld [smem:[#allocation20_spill]]  ;;  %s1626_s27 = sand.u32 1, %s2525_s30  }
 0xd88   : > { %p3184_p0 = scmp.ge.s32.totalorder %s2537_s12, 2  ;;  %s1627_s29 = scalar_lea.sflag [#allocation4], %s1626_s27 }
 0xd8d   : > { %p3183_p9 = scmp.ne.s32.totalorder %s3182_s21, 0 }
 0xd8f   : > { %p2173_p8 = pnand %p3184_p0, %p3183_p9 }
 0xd91   : > { %2516 = dma.done.wait (!%p2173_p8), %s1627_s29, 256  }
 0xd92   : > { %2518 = vsyncadd (!%p2173_p8), %s1627_s29, 4294967040  ;;  %s1636_s26 = scalar_lea.sflag [#allocation12], %s1626_s27 }
 0xd93   : > { %2520 = dma.done.wait (!%p2173_p8), %s1636_s26, 256  }
 0xd94   : > { %2522 = vsyncadd (!%p2173_p8), %s1636_s26, 4294967040  ;;  %s3185_s18 = sld [smem:[#allocation19_spill]]  ;;  %s3186_s11 = sld [smem:[#allocation21_spill]] }
 0xd95   : > { %p30_p6 = scmp.ge.s32.totalorder %s2718_s20, 4   ;;  %s3187_s30 = smov %s2529_s10 }
 0xd96   : > { %s3189_s12 = smov %s2718_s20 }
 0xd97   :  { %32 = sbr.rel (!%p30_p6) target bundleno = 14 (0xe), region = 141 }
 0xd9a   : > { %s3188_s10 = smov %s3185_s18 }
 0xd9e   :  { %1641 = vsyncpa [#allocation3], 1 }
 0xd9f   :  { %1643 = vsyncpa [#allocation3 + $0x1], 1 }
 0xda0   :  { %1644 = vsyncpa [#allocation6], 1 }
 0xda1   :  { %1646 = vsyncpa [#allocation6 + $0x1], 1 }
 0xda2   :  { %1647 = vsyncpa [#allocation9], 1 }
 0xda3   :  { %1648 = vsyncpa [#allocation4], 1 }
 0xda4   :  { %1650 = vsyncpa [#allocation4 + $0x1], 1 }
 0xda5   :  { %1651 = vsyncpa [#allocation12], 1 }
 0xda6   :  { %1653 = vsyncpa [#allocation12 + $0x1], 1 }

</bundles_post_ra>
